<compile_context>
chip_gen: v5e
topology: v5e:2x2
jax: 0.10.0
libtpu: 0.0.40
codegen_flags: <defaults>
</compile_context>

<pallas_src>
from functools import partial

import jax
import jax.numpy as jnp
import numpy as np
from jax.experimental import pallas as pl
from jax.experimental.pallas import tpu as pltpu


# Conservative default budget for the (double-buffered) output tile: stays
# under v5e's 16 MiB default scoped-VMEM limit with room to spare, so no
# vmem_limit_bytes override is needed on any generation in the common case.
_DEFAULT_VMEM_BUDGET = 8 << 20
_SMALL_N_THRESHOLD = 16   # <=: scalar-prefetch path; >: (N,1) VMEM-column path


def _vmem_budget_bytes() -> int:
    """Generation-aware VMEM budget for the output tile (incl. double buffer)."""
    budget = _DEFAULT_VMEM_BUDGET
    try:
        # v7x: 64 MiB physical VMEM per TC (vs 128 MiB on v5e/v6e) -- never let
        # this tiny kernel claim more than a quarter of physical VMEM.
        cap = int(pltpu.get_tpu_info().vmem_capacity_bytes)
        budget = min(budget, cap // 4)
    except Exception:
        pass
    return max(budget, 64 << 10)


def _pick_tile_f(freq_bins: int, num_experts: int, itemsize: int,
                 budget_override=None) -> int:
    """Largest F-tile that fits the VMEM budget; single block whenever possible."""
    budget = budget_override if budget_override is not None else _vmem_budget_bytes()
    # Output is double-buffered by the BlockSpec pipeline: 2 * N * tile_f * itemsize.
    max_tile = budget // (2 * max(num_experts, 1) * itemsize)
    if freq_bins <= max_tile:
        return freq_bins                       # single block -> grid of 1 step
    if freq_bins % 128 == 0 and max_tile >= 128:
        tile = (max_tile // 128) * 128         # lane-dense (multiple of 128)
        while tile >= 128 and freq_bins % tile != 0:
            tile -= 128
        if tile >= 128:
            return tile
    # Pathological F (huge and not 128-divisible): fall back to one full-width
    # block; the wrapper raises vmem_limit_bytes for this case.
    return freq_bins


def _freq_band_mask_kernel_smem(start_ref, end_ref, out_ref):
    """Small-N path: start/end are (N,) int32 scalar-prefetch refs in SMEM."""
    n, tile_f = out_ref.shape
    base = pl.program_id(0) * tile_f           # element offset of this F-tile

    # Expand the SMEM scalars into per-expert (N, 1) columns with a short,
    # statically-unrolled select chain (N is small & static).
    row = jax.lax.broadcasted_iota(jnp.int32, (n, 1), 0)
    start_col = jnp.zeros((n, 1), jnp.int32)
    end_col = jnp.zeros((n, 1), jnp.int32)
    for i in range(n):
        start_col = jnp.where(row == i, start_ref[i], start_col)
        end_col = jnp.where(row == i, end_ref[i], end_col)

    # Fold the tile base into the (N, 1) columns instead of adding a full-tile
    # int32 to the iota (saves one full-tile VALU op per step).
    start_col = start_col - base
    end_col = end_col - base

    col = jax.lax.broadcasted_iota(jnp.int32, (n, tile_f), 1)
    mask = jnp.logical_and(col >= start_col, col < end_col)
    out_ref[...] = mask.astype(out_ref.dtype)


def _freq_band_mask_kernel_vmem(start_ref, end_ref, out_ref):
    """Large-N path: start/end are (N, 1) int32 VMEM columns, direct broadcast."""
    n, tile_f = out_ref.shape
    base = pl.program_id(0) * tile_f
    start_col = start_ref[...] - base           # (N, 1)
    end_col = end_ref[...] - base               # (N, 1)
    col = jax.lax.broadcasted_iota(jnp.int32, (n, tile_f), 1)
    mask = jnp.logical_and(col >= start_col, col < end_col)
    out_ref[...] = mask.astype(out_ref.dtype)


@partial(jax.jit, static_argnums=(1, 2),
         static_argnames=("out_dtype", "vmem_budget_override"))
def frequency_bands_forward(bound_params, num_experts, freq_bins, *,
                            out_dtype=jnp.float32, vmem_budget_override=None):
    """JAX/Pallas equivalent of FrequencyBands.forward(). Returns (N, F)."""
    N, F = num_experts, freq_bins
    assert bound_params.shape == (N - 1,)

    # --- glue: (N+1) scalars of sigmoid / concat / sort (plain JAX, same jit)
    raw = jax.nn.sigmoid(bound_params.astype(jnp.float32))
    all_bounds = jnp.concatenate(
        [jnp.zeros((1,), jnp.float32), raw, jnp.ones((1,), jnp.float32)]
    )
    sorted_bounds = jnp.sort(all_bounds)                    # (N+1,)
    indices = (sorted_bounds * (F - 1)).astype(jnp.int32)   # truncation == .long()

    start_idx = indices[:N]                                                 # (N,)
    end_idx = jnp.concatenate([indices[1:N], jnp.array([F], jnp.int32)])    # (N,)

    # --- hot path: lane-dense (N, tile_f) mask tiles built on the VPU -------
    out_itemsize = jnp.dtype(out_dtype).itemsize
    tile_f = _pick_tile_f(F, N, out_itemsize, vmem_budget_override)
    num_tiles = pl.cdiv(F, tile_f)              # tile_f divides F (or equals F)

    # Only split the F axis across v7x's two TensorCores when there is enough
    # per-tile writeback to amortize a second core prologue.
    per_tile_bytes = N * tile_f * out_itemsize
    dims = ("parallel",) if (num_tiles >= 2 and per_tile_bytes >= (256 << 10)) \
        else ("arbitrary",)

    # Raise the scoped-VMEM limit only for the rare full-width fallback tile
    # that exceeds the conservative default budget.
    needed_bytes = 2 * N * tile_f * out_itemsize
    vmem_limit = None
    if needed_bytes > _DEFAULT_VMEM_BUDGET:
        vmem_limit = min(needed_bytes + (4 << 20), 96 << 20)

    compiler_params = pltpu.CompilerParams(
        dimension_semantics=dims,
        vmem_limit_bytes=vmem_limit,
    )
    cost = pl.CostEstimate(flops=4 * N * F, transcendentals=0,
                           bytes_accessed=N * F * out_itemsize)
    out_shape = jax.ShapeDtypeStruct((N, F), out_dtype)

    if N <= _SMALL_N_THRESHOLD:
        grid_spec = pltpu.PrefetchScalarGridSpec(
            num_scalar_prefetch=2,              # start_idx, end_idx -> SMEM
            grid=(num_tiles,),
            in_specs=[],
            out_specs=pl.BlockSpec((N, tile_f), lambda t, start, end: (0, t)),
        )
        return pl.pallas_call(
            _freq_band_mask_kernel_smem,
            out_shape=out_shape,
            grid_spec=grid_spec,
            compiler_params=compiler_params,
            cost_estimate=cost,
        )(start_idx, end_idx)

    # Large-N path: (N, 1) int32 columns as a tiny VMEM input (one ~4 KiB tile),
    # broadcast directly against the lane iota -- no O(N) select chain.
    start_col = start_idx.reshape(N, 1)
    end_col = end_idx.reshape(N, 1)
    return pl.pallas_call(
        _freq_band_mask_kernel_vmem,
        out_shape=out_shape,
        grid=(num_tiles,),
        in_specs=[pl.BlockSpec((N, 1), lambda t: (0, 0)),
                  pl.BlockSpec((N, 1), lambda t: (0, 0))],
        out_specs=pl.BlockSpec((N, tile_f), lambda t: (0, t)),
        compiler_params=compiler_params,
        cost_estimate=cost,
    )(start_col, end_col)


def _reference_numpy(raw_sigmoid: np.ndarray, N: int, F: int) -> np.ndarray:
    """Numpy port of FrequencyBands.forward operating on precomputed sigmoid.

    The sigmoid is taken as an input (computed once with jax.nn.sigmoid) so the
    atol=0 check is not fragile to 1-ulp sigmoid differences landing exactly on
    an integer boundary of the floor step; concat/sort/index/mask below is an
    independent float32 numpy port of the torch code.
    """
    all_bounds = np.concatenate(
        [np.zeros(1, np.float32), raw_sigmoid.astype(np.float32),
         np.ones(1, np.float32)]
    ).astype(np.float32)
    sorted_bounds = np.sort(all_bounds)
    indices = (sorted_bounds * np.float32(F - 1)).astype(np.int64)  # trunc (nonneg)
    masks = []
    for i in range(N):
        s = int(indices[i])
        e = int(indices[i + 1]) if i < N - 1 else F
        m = np.zeros(F, dtype=np.float32)
        if e > s:
            m[s:e] = 1.0
        masks.append(m)
    return np.stack(masks, axis=0)


if __name__ == "__main__":
    key = jax.random.PRNGKey(0)

    # --- small-N path (scalar prefetch), tiny F: single full-width block -----
    N1, F1 = 4, 16
    bp_small = 0.5 * jax.random.normal(key, (N1 - 1,), dtype=jnp.float32)
    raw_small = np.asarray(jax.nn.sigmoid(bp_small.astype(jnp.float32)))

    out1 = jax.block_until_ready(frequency_bands_forward(bp_small, N1, F1))
    np.testing.assert_allclose(np.asarray(out1),
                               _reference_numpy(raw_small, N1, F1),
                               rtol=0, atol=0)

    # --- small-N path, larger F: VMEM budget collapses the grid to 1 step ----
    N2, F2 = 4, 4096
    out2 = jax.block_until_ready(frequency_bands_forward(bp_small, N2, F2))
    ref2 = _reference_numpy(raw_small, N2, F2)
    np.testing.assert_allclose(np.asarray(out2), ref2, rtol=0, atol=0)

    # --- same size, forced multi-tile path (tiny budget override) to exercise
    #     the lane-dense tiled store + folded base-offset math ----------------
    out3 = jax.block_until_ready(
        frequency_bands_forward(bp_small, N2, F2, vmem_budget_override=32 << 10))
    np.testing.assert_allclose(np.asarray(out3), ref2, rtol=0, atol=0)

    # --- large-N path ((N,1) VMEM columns instead of the select chain) -------
    N4, F4 = 32, 2048
    bp_big = 0.5 * jax.random.normal(jax.random.PRNGKey(0), (N4 - 1,),
                                     dtype=jnp.float32)
    raw_big = np.asarray(jax.nn.sigmoid(bp_big.astype(jnp.float32)))
    out4 = jax.block_until_ready(frequency_bands_forward(bp_big, N4, F4))
    np.testing.assert_allclose(np.asarray(out4),
                               _reference_numpy(raw_big, N4, F4),
                               rtol=0, atol=0)

    print("KERNEL_OK")
</pallas_src>

<mosaic_0001>
module attributes {stable_mosaic.version = 11 : i64} {
  func.func @_freq_band_mask_kernel_smem(%arg0: i32, %arg1: memref<4xi32, #tpu.memory_space<smem>>, %arg2: memref<4xi32, #tpu.memory_space<smem>>, %arg3: memref<4x16xf32, #tpu.memory_space<vmem>>) attributes {dimension_semantics = [#tpu.dimension_semantics<arbitrary>], iteration_bounds = array<i64: 1>, scalar_prefetch = 2 : i64, scratch_operands = 0 : i64, tpu.core_type = #tpu.core_type<tc>, window_params = [{transform_indices = @transform_0, window_bounds = array<i64: 4, 16>}]} {
    %c16_i32 = arith.constant 16 : i32
    %0 = arith.muli %arg0, %c16_i32 : i32
    %1 = tpu.iota {dimensions = array<i32: 0>} : vector<4x1xi32>
    %c0_i32 = arith.constant 0 : i32
    %2 = vector.broadcast %c0_i32 : i32 to vector<4x1xi32>
    %c0_i32_0 = arith.constant 0 : i32
    %3 = vector.broadcast %c0_i32_0 : i32 to vector<4x1xi32>
    %c0_i32_1 = arith.constant 0 : i32
    %4 = vector.broadcast %c0_i32_1 : i32 to vector<4x1xi32>
    %5 = arith.cmpi eq, %1, %4 : vector<4x1xi32>
    %c0 = arith.constant 0 : index
    %6 = memref.load %arg1[%c0] : memref<4xi32, #tpu.memory_space<smem>>
    %7 = vector.broadcast %6 : i32 to vector<4x1xi32>
    %8 = arith.select %5, %7, %2 : vector<4x1xi1>, vector<4x1xi32>
    %c0_i32_2 = arith.constant 0 : i32
    %9 = vector.broadcast %c0_i32_2 : i32 to vector<4x1xi32>
    %10 = arith.cmpi eq, %1, %9 : vector<4x1xi32>
    %c0_3 = arith.constant 0 : index
    %11 = memref.load %arg2[%c0_3] : memref<4xi32, #tpu.memory_space<smem>>
    %12 = vector.broadcast %11 : i32 to vector<4x1xi32>
    %13 = arith.select %10, %12, %3 : vector<4x1xi1>, vector<4x1xi32>
    %c1_i32 = arith.constant 1 : i32
    %14 = vector.broadcast %c1_i32 : i32 to vector<4x1xi32>
    %15 = arith.cmpi eq, %1, %14 : vector<4x1xi32>
    %c1 = arith.constant 1 : index
    %16 = memref.load %arg1[%c1] : memref<4xi32, #tpu.memory_space<smem>>
    %17 = vector.broadcast %16 : i32 to vector<4x1xi32>
    %18 = arith.select %15, %17, %8 : vector<4x1xi1>, vector<4x1xi32>
    %c1_i32_4 = arith.constant 1 : i32
    %19 = vector.broadcast %c1_i32_4 : i32 to vector<4x1xi32>
    %20 = arith.cmpi eq, %1, %19 : vector<4x1xi32>
    %c1_5 = arith.constant 1 : index
    %21 = memref.load %arg2[%c1_5] : memref<4xi32, #tpu.memory_space<smem>>
    %22 = vector.broadcast %21 : i32 to vector<4x1xi32>
    %23 = arith.select %20, %22, %13 : vector<4x1xi1>, vector<4x1xi32>
    %c2_i32 = arith.constant 2 : i32
    %24 = vector.broadcast %c2_i32 : i32 to vector<4x1xi32>
    %25 = arith.cmpi eq, %1, %24 : vector<4x1xi32>
    %c2 = arith.constant 2 : index
    %26 = memref.load %arg1[%c2] : memref<4xi32, #tpu.memory_space<smem>>
    %27 = vector.broadcast %26 : i32 to vector<4x1xi32>
    %28 = arith.select %25, %27, %18 : vector<4x1xi1>, vector<4x1xi32>
    %c2_i32_6 = arith.constant 2 : i32
    %29 = vector.broadcast %c2_i32_6 : i32 to vector<4x1xi32>
    %30 = arith.cmpi eq, %1, %29 : vector<4x1xi32>
    %c2_7 = arith.constant 2 : index
    %31 = memref.load %arg2[%c2_7] : memref<4xi32, #tpu.memory_space<smem>>
    %32 = vector.broadcast %31 : i32 to vector<4x1xi32>
    %33 = arith.select %30, %32, %23 : vector<4x1xi1>, vector<4x1xi32>
    %c3_i32 = arith.constant 3 : i32
    %34 = vector.broadcast %c3_i32 : i32 to vector<4x1xi32>
    %35 = arith.cmpi eq, %1, %34 : vector<4x1xi32>
    %c3 = arith.constant 3 : index
    %36 = memref.load %arg1[%c3] : memref<4xi32, #tpu.memory_space<smem>>
    %37 = vector.broadcast %36 : i32 to vector<4x1xi32>
    %38 = arith.select %35, %37, %28 : vector<4x1xi1>, vector<4x1xi32>
    %c3_i32_8 = arith.constant 3 : i32
    %39 = vector.broadcast %c3_i32_8 : i32 to vector<4x1xi32>
    %40 = arith.cmpi eq, %1, %39 : vector<4x1xi32>
    %c3_9 = arith.constant 3 : index
    %41 = memref.load %arg2[%c3_9] : memref<4xi32, #tpu.memory_space<smem>>
    %42 = vector.broadcast %41 : i32 to vector<4x1xi32>
    %43 = arith.select %40, %42, %33 : vector<4x1xi1>, vector<4x1xi32>
    %44 = vector.broadcast %0 : i32 to vector<4x1xi32>
    %45 = arith.subi %38, %44 : vector<4x1xi32>
    %46 = vector.broadcast %0 : i32 to vector<4x1xi32>
    %47 = arith.subi %43, %46 : vector<4x1xi32>
    %48 = tpu.iota {dimensions = array<i32: 1>} : vector<4x16xi32>
    %49 = vector.broadcast %45 : vector<4x1xi32> to vector<4x16xi32>
    %50 = arith.cmpi sge, %48, %49 : vector<4x16xi32>
    %51 = vector.broadcast %47 : vector<4x1xi32> to vector<4x16xi32>
    %52 = arith.cmpi slt, %48, %51 : vector<4x16xi32>
    %53 = arith.andi %50, %52 : vector<4x16xi1>
    %54 = arith.extui %53 : vector<4x16xi1> to vector<4x16xi32>
    %55 = arith.sitofp %54 : vector<4x16xi32> to vector<4x16xf32>
    %c0_10 = arith.constant 0 : index
    %c0_11 = arith.constant 0 : index
    %56 = vector.load %arg3[%c0_10, %c0_11] : memref<4x16xf32, #tpu.memory_space<vmem>>, vector<4x16xf32>
    tpu.vector_store %arg3[%c0_10, %c0_11], %55 {strides = array<i32>} : memref<4x16xf32, #tpu.memory_space<vmem>>, vector<4x16xf32>,
    return
  }
  func.func @transform_0(%arg0: i32, %arg1: memref<4xi32, #tpu.memory_space<smem>>, %arg2: memref<4xi32, #tpu.memory_space<smem>>) -> (i32, i32) {
    %c0_i32 = arith.constant 0 : i32
    %c0_i32_0 = arith.constant 0 : i32
    return %c0_i32, %arg0 : i32, i32
  }
}

</mosaic_0001>

<bundles_post_ra>
// kernel: frequency_bands_forward.1
= control target key start
LH: loop header
LB: loop body
LE: loop exit
PB: predicated region body
PF: predicated region fallthrough
CT: control target
= control target key end

     0   :  { %s143_s15 = smov [#allocation3]   ;;  %s144_s16 = smov [#allocation4]   ;;  %s171_s0 = inlined_call_operand.vmem [shape: s32[4], index: 0, kind: input, shape index: {}]   ;;  %s172_s2 = inlined_call_operand.hbm [shape: f32[4,16], index: 2, kind: output, shape index: {}]   ;;  %s173_s1 = inlined_call_operand.vmem [shape: s32[4], index: 1, kind: input, shape index: {}]  }
   0x1   :  { %s8_s11 = sshll.u32 %s171_s0, 4  ;;  %s13_s14 = sshll.u32 %s173_s1, 4  ;;  %s9_s11 = int_to_ptr.vmem [resolvable:$true] %s8_s11  ;;  %s14_s14 = int_to_ptr.vmem [resolvable:$true] %s13_s14 }
   0x2   :  { %11 = dma.vmem_to_smem %s9_s11, 16, %s143_s15, [#allocation2] }
   0x3   :  { %16 = dma.vmem_to_smem %s14_s14, 16, %s144_s16, [#allocation2] }
   0x4   :  { %139 = dma.done.wait [#allocation2], 32 }
   0x5   :  { %140 = vsyncadd [#allocation2], 4294967264 }
   0x6   :  { %19 = sfence }
   0x7   :  { %v22_v0 = vlaneseq  ;;  %s25_s17 = sld [smem:[#allocation3]] }
   0x8   :  { %20 = vsyncpa [#allocation6], 0  ;;  %s28_s18 = sld [smem:[#allocation4]]  ;;  %s145_s23 = smov [#allocation5]   ;;  %vm62_vm6 = vcmask 125952   ;;  %v146_v19 = vmov 0.0  }
   0x9   :  { %v23_v1 = vshrl.u32 %v22_v0, 7  ;;  %s80_s19 = sld [smem:[#allocation3 + $0x1]]  ;;  %v56_v11 = vand.u32 127, %v22_v0  ;;  %s69_s24 = sshll.u32 %s145_s23, 4  ;;  %s70_s24 = int_to_ptr.vmem [resolvable:$true] %s69_s24 }
   0xa   :  { %s81_s0 = sld [smem:[#allocation4 + $0x1]]  ;;  %s71_s27 = sshll.u32 %s172_s2, 4  ;;  %s72_s27 = int_to_ptr.hbm [resolvable:$true] %s71_s27 }
   0xb   :  { %vm24_vm0 = vcmp.eq.s32.totalorder %v23_v1, 0  ;;  %s82_s20 = sld [smem:[#allocation3 + $0x2]]  ;;  %vm31_vm1 = vcmp.eq.s32.totalorder %v23_v1, 1  ;;  %vm38_vm2 = vcmp.eq.s32.totalorder %v23_v1, 2  ;;  %vm45_vm3 = vcmp.eq.s32.totalorder %v23_v1, 3 }
   0xc   :  { %s83_s21 = sld [smem:[#allocation4 + $0x2]] }
   0xd   :  { %v26_v2 = vstv %s25_s17  ;;  %s84_s1 = sld [smem:[#allocation3 + $0x3]] }
   0xe   :  { %v27_v3 = vsel %vm24_vm0, %v26_v2, 0  ;;  %v29_v4 = vstv %s28_s18  ;;  %s85_s22 = sld [smem:[#allocation4 + $0x3]] }
   0xf   :  { %v30_v5 = vsel %vm24_vm0, %v29_v4, 0  ;;  %v33_v6 = vstv %s80_s19 }
  0x10   :  { %v34_v7 = vsel %vm31_vm1, %v33_v6, %v27_v3  ;;  %v36_v8 = vstv %s81_s0 }
  0x11   :  { %v37_v9 = vsel %vm31_vm1, %v36_v8, %v30_v5  ;;  %v40_v10 = vstv %s82_s20 }
  0x12   :  { %v41_v12 = vsel %vm38_vm2, %v40_v10, %v34_v7  ;;  %v43_v13 = vstv %s83_s21 }
  0x13   :  { %v44_v14 = vsel %vm38_vm2, %v43_v13, %v37_v9  ;;  %v47_v15 = vstv %s84_s1 }
  0x14   :  { %v48_v16 = vsel %vm45_vm3, %v47_v15, %v41_v12  ;;  %v50_v17 = vstv %s85_s22 }
  0x15   :  { %v51_v18 = vsel %vm45_vm3, %v50_v17, %v44_v14  ;;  %vm57_vm4 = vcmp.ge.s32.totalorder %v56_v11, %v48_v16 }
  0x16   :  { %vm58_vm5 = vcmp.lt.s32.totalorder %v56_v11, %v51_v18 }
  0x17   :  { %vm59_vm7 = vmand %vm57_vm4, %vm58_vm5 }
  0x18   :  { %v86_v20 = vsel %vm59_vm7, 1.0, %v146_v19 }
  0x19   :  { %63 = vst.msk [vmem:[#allocation5] sm:$0xf] %vm62_vm6, %v86_v20 }
  0x1a   :  { %74 = dma.vmem_to_hbm [thread:$0]  %s70_s24, 64, %s72_s27, [#allocation6]  }
  0x1b   :  { %141 = dma.done.wait [#allocation6], 64  }
  0x1c   :  { %142 = vsyncadd [#allocation6], 4294967232 }
  0x1d   :  { %79 = vsyncpa [#allocation6], 1 }

</bundles_post_ra>
